<compile_context>
chip_gen: v7x
topology: tpu7x:2x2x1
jax: 0.10.0
libtpu: 0.0.40
codegen_flags: <defaults>
</compile_context>

<pallas_src>
import jax
import jax.numpy as jnp
from jax.experimental import pallas as pl
from jax.experimental.pallas import tpu as pltpu

N_FEATURES = 6                     # n_features_selected in the PyTorch module
_LANE = 128
_SUBLANE_PAD = 8                   # f32 tiles pad the second-minor dim to 8
_DEFAULT_BATCH_TILE = 32 * 1024    # cap on rows per grid step (multiple of 128)
_MIN_TILE = 1024                   # never shrink tiles below this for grid count
_MEGACORE_TILES = 8                # target >= this many grid steps on big batches


def _round_up(n, m):
    return ((n + m - 1) // m) * m


def _linear_sigmoid_kernel(xt_ref, w_ref, b_ref, o_ref):
    # xt_ref: [F, TB] f32 VMEM  -- batch on the lane axis (lane-dense)
    # w_ref:  [F]     f32 SMEM  -- nn.Linear weight row, read as scalars
    # b_ref:  [1]     f32 SMEM  -- nn.Linear bias
    # o_ref:  [1, TB] f32 VMEM  -- lane-dense output row
    nfeat = xt_ref.shape[0]
    z = xt_ref[0:1, :] * w_ref[0]
    for f in range(1, nfeat):                  # static unroll, F == 6
        z = z + xt_ref[f:f + 1, :] * w_ref[f]
    o_ref[...] = jax.nn.sigmoid(z + b_ref[0])


def _pick_batch_tile(batch, batch_tile_cap):
    """Rows per grid step: multiple of 128 (or the full batch if batch <= 128)."""
    if batch <= _LANE:
        return batch                            # single full-extent tile (legal block)
    cap = max(_LANE, (int(batch_tile_cap) // _LANE) * _LANE)
    nb = _round_up(batch, _LANE) // _LANE       # number of 128-row lane groups
    tb = min(cap, nb * _LANE)
    # Keep >= ~_MEGACORE_TILES grid steps on large batches so ("parallel",)
    # can shard tiles across both v7x TensorCores, but never shrink below
    # _MIN_TILE just to add steps.
    tb_mc = pl.cdiv(nb, _MEGACORE_TILES) * _LANE
    if tb_mc >= _MIN_TILE:
        tb = min(tb, tb_mc)
    return max(tb, _LANE)


def laplace_classifier_forward(x, weight, bias, *, batch_tile=_DEFAULT_BATCH_TILE):
    """Pallas forward pass.

    Args:
      x:      float   [batch, n_features]
      weight: float32 [1, n_features]   (nn.Linear.weight convention)
      bias:   float32 [1]               (nn.Linear.bias)

    Returns:
      float32 [batch, 1] == sigmoid(x @ weight.T + bias)
    """
    x = jnp.asarray(x).astype(jnp.float32)
    batch, nfeat = x.shape
    w1d = jnp.asarray(weight, dtype=jnp.float32).reshape(nfeat)
    b1d = jnp.asarray(bias, dtype=jnp.float32).reshape(1)

    # Lane-major batch: (batch, F) -> (F, batch).  Layout plumbing only.
    xt = x.T

    tb = _pick_batch_tile(batch, batch_tile)
    grid = (pl.cdiv(batch, tb),)

    # Real (sublane-padded) VMEM footprint of one double-buffered step:
    # xT tile (8, TB) f32 + out tile (8, TB) f32, each double-buffered.
    step_bytes = 2 * (_SUBLANE_PAD * tb * 4) + 2 * (_SUBLANE_PAD * tb * 4)
    vmem_limit = int(min(max(4 * step_bytes, 16 << 20), 48 << 20))

    out_row = pl.pallas_call(
        _linear_sigmoid_kernel,
        out_shape=jax.ShapeDtypeStruct((1, batch), jnp.float32),
        grid=grid,
        in_specs=[
            # xT: batch tiled along lanes; feature axis kept at full width.
            pl.BlockSpec((nfeat, tb), lambda i: (0, i)),
            # weights: (F,) scalars in SMEM.
            pl.BlockSpec(memory_space=pltpu.MemorySpace.SMEM),
            # bias: (1,) scalar in SMEM.
            pl.BlockSpec(memory_space=pltpu.MemorySpace.SMEM),
        ],
        out_specs=pl.BlockSpec((1, tb), lambda i: (0, i)),
        compiler_params=pltpu.CompilerParams(
            dimension_semantics=("parallel",),   # batch tiles are independent
            vmem_limit_bytes=vmem_limit,
        ),
        cost_estimate=pl.CostEstimate(
            flops=2 * nfeat * batch,
            transcendentals=batch,
            bytes_accessed=(nfeat + 1) * 4 * batch + (nfeat + 1) * 4,
        ),
    )(xt, w1d, b1d)

    # (1, batch) and (batch, 1) share the same flat layout -> free reshape.
    return out_row.reshape(batch, 1)


def _reference_forward(x, weight, bias):
    # Elementwise f32 reference (avoids any MXU/bf16 precision in the check).
    z = jnp.sum(x.astype(jnp.float32) * weight.reshape(1, -1), axis=-1,
                keepdims=True) + bias
    return jax.nn.sigmoid(z)


if __name__ == "__main__":
    key = jax.random.PRNGKey(0)
    k_w, k_b, k_x, k_x2 = jax.random.split(key, 4)

    # nn.Linear(6, 1) shapes with weight/bias ~ N(0, 1) as in the module init.
    weight = jax.random.normal(k_w, (1, N_FEATURES), dtype=jnp.float32)
    bias = jax.random.normal(k_b, (1,), dtype=jnp.float32)

    # Small input consistent with the module: batch=2, n_features=6.
    x = jax.random.normal(k_x, (2, N_FEATURES), dtype=jnp.float32)
    out = jax.block_until_ready(laplace_classifier_forward(x, weight, bias))
    ref = _reference_forward(x, weight, bias)
    assert out.shape == (2, 1), out.shape
    assert jnp.allclose(out, ref, atol=1e-5, rtol=1e-5), (out, ref)

    # Multi-tile grid with a tail block (300 rows, 128-row tiles -> grid=(3,)),
    # exercising OOB-read / masked-write handling on the last tile.
    x2 = jax.random.normal(k_x2, (300, N_FEATURES), dtype=jnp.float32)
    out2 = jax.block_until_ready(
        laplace_classifier_forward(x2, weight, bias, batch_tile=128))
    ref2 = _reference_forward(x2, weight, bias)
    assert out2.shape == (300, 1), out2.shape
    assert jnp.allclose(out2, ref2, atol=1e-5, rtol=1e-5), (out2, ref2)

    print("KERNEL_OK")
</pallas_src>

<mosaic_0001>
module attributes {stable_mosaic.version = 11 : i64} {
  func.func @_linear_sigmoid_kernel(%arg0: i32, %arg1: memref<6x2xf32, #tpu.memory_space<vmem>>, %arg2: memref<6xf32, #tpu.memory_space<smem>>, %arg3: memref<1xf32, #tpu.memory_space<smem>>, %arg4: memref<1x2xf32, #tpu.memory_space<vmem>>) attributes {dimension_semantics = [#tpu.dimension_semantics<parallel>], iteration_bounds = array<i64: 1>, scalar_prefetch = 0 : i64, scratch_operands = 0 : i64, tpu.core_type = #tpu.core_type<tc>, window_params = [{transform_indices = @transform_0, window_bounds = array<i64: 6, 2>}, {transform_indices = @transform_1, window_bounds = array<i64: 6>}, {transform_indices = @transform_2, window_bounds = array<i64: 1>}, {transform_indices = @transform_3, window_bounds = array<i64: 1, 2>}]} {
    %c0 = arith.constant 0 : index
    %c0_0 = arith.constant 0 : index
    %0 = vector.load %arg1[%c0, %c0_0] : memref<6x2xf32, #tpu.memory_space<vmem>>, vector<1x2xf32>
    %c0_1 = arith.constant 0 : index
    %1 = memref.load %arg2[%c0_1] : memref<6xf32, #tpu.memory_space<smem>>
    %2 = vector.broadcast %1 : f32 to vector<1x2xf32>
    %3 = arith.mulf %0, %2 : vector<1x2xf32>
    %c1 = arith.constant 1 : index
    %c0_2 = arith.constant 0 : index
    %4 = vector.load %arg1[%c1, %c0_2] : memref<6x2xf32, #tpu.memory_space<vmem>>, vector<1x2xf32>
    %c1_3 = arith.constant 1 : index
    %5 = memref.load %arg2[%c1_3] : memref<6xf32, #tpu.memory_space<smem>>
    %6 = vector.broadcast %5 : f32 to vector<1x2xf32>
    %7 = arith.mulf %4, %6 : vector<1x2xf32>
    %8 = arith.addf %3, %7 : vector<1x2xf32>
    %c2 = arith.constant 2 : index
    %c0_4 = arith.constant 0 : index
    %9 = vector.load %arg1[%c2, %c0_4] : memref<6x2xf32, #tpu.memory_space<vmem>>, vector<1x2xf32>
    %c2_5 = arith.constant 2 : index
    %10 = memref.load %arg2[%c2_5] : memref<6xf32, #tpu.memory_space<smem>>
    %11 = vector.broadcast %10 : f32 to vector<1x2xf32>
    %12 = arith.mulf %9, %11 : vector<1x2xf32>
    %13 = arith.addf %8, %12 : vector<1x2xf32>
    %c3 = arith.constant 3 : index
    %c0_6 = arith.constant 0 : index
    %14 = vector.load %arg1[%c3, %c0_6] : memref<6x2xf32, #tpu.memory_space<vmem>>, vector<1x2xf32>
    %c3_7 = arith.constant 3 : index
    %15 = memref.load %arg2[%c3_7] : memref<6xf32, #tpu.memory_space<smem>>
    %16 = vector.broadcast %15 : f32 to vector<1x2xf32>
    %17 = arith.mulf %14, %16 : vector<1x2xf32>
    %18 = arith.addf %13, %17 : vector<1x2xf32>
    %c4 = arith.constant 4 : index
    %c0_8 = arith.constant 0 : index
    %19 = vector.load %arg1[%c4, %c0_8] : memref<6x2xf32, #tpu.memory_space<vmem>>, vector<1x2xf32>
    %c4_9 = arith.constant 4 : index
    %20 = memref.load %arg2[%c4_9] : memref<6xf32, #tpu.memory_space<smem>>
    %21 = vector.broadcast %20 : f32 to vector<1x2xf32>
    %22 = arith.mulf %19, %21 : vector<1x2xf32>
    %23 = arith.addf %18, %22 : vector<1x2xf32>
    %c5 = arith.constant 5 : index
    %c0_10 = arith.constant 0 : index
    %24 = vector.load %arg1[%c5, %c0_10] : memref<6x2xf32, #tpu.memory_space<vmem>>, vector<1x2xf32>
    %c5_11 = arith.constant 5 : index
    %25 = memref.load %arg2[%c5_11] : memref<6xf32, #tpu.memory_space<smem>>
    %26 = vector.broadcast %25 : f32 to vector<1x2xf32>
    %27 = arith.mulf %24, %26 : vector<1x2xf32>
    %28 = arith.addf %23, %27 : vector<1x2xf32>
    %c0_12 = arith.constant 0 : index
    %29 = memref.load %arg3[%c0_12] : memref<1xf32, #tpu.memory_space<smem>>
    %30 = vector.broadcast %29 : f32 to vector<1x2xf32>
    %31 = arith.addf %28, %30 : vector<1x2xf32>
    %32 = arith.negf %31 : vector<1x2xf32>
    %33 = math.exp %32 : vector<1x2xf32>
    %cst = arith.constant 1.000000e+00 : f32
    %34 = vector.broadcast %cst : f32 to vector<1x2xf32>
    %35 = arith.addf %34, %33 : vector<1x2xf32>
    %36 = arith.divf %34, %35 : vector<1x2xf32>
    %c0_13 = arith.constant 0 : index
    %c0_14 = arith.constant 0 : index
    %37 = vector.load %arg4[%c0_13, %c0_14] : memref<1x2xf32, #tpu.memory_space<vmem>>, vector<1x2xf32>
    tpu.vector_store %arg4[%c0_13, %c0_14], %36 {strides = array<i32>} : memref<1x2xf32, #tpu.memory_space<vmem>>, vector<1x2xf32>,
    return
  }
  func.func @transform_0(%arg0: i32) -> (i32, i32) {
    %c0_i32 = arith.constant 0 : i32
    %c0_i32_0 = arith.constant 0 : i32
    return %c0_i32, %arg0 : i32, i32
  }
  func.func @transform_1(%arg0: i32) -> i32 {
    %c0_i32 = arith.constant 0 : i32
    %c0_i32_0 = arith.constant 0 : i32
    return %c0_i32 : i32
  }
  func.func @transform_2(%arg0: i32) -> i32 {
    %c0_i32 = arith.constant 0 : i32
    %c0_i32_0 = arith.constant 0 : i32
    return %c0_i32 : i32
  }
  func.func @transform_3(%arg0: i32) -> (i32, i32) {
    %c0_i32 = arith.constant 0 : i32
    %c0_i32_0 = arith.constant 0 : i32
    return %c0_i32, %arg0 : i32, i32
  }
}

</mosaic_0001>

<bundles_post_ra>
// kernel: tpu_custom_call.1
= control target key start
LH: loop header
LB: loop body
LE: loop exit
PB: predicated region body
PF: predicated region fallthrough
CT: control target
= control target key end

     0   :  { %9 = vsyncpa [#allocation5], 0  ;;  %s192_s0 = inlined_call_operand.vmem [shape: f32[6,2], index: 0, kind: input, shape index: {}]   ;;  %s193_s1 = inlined_call_operand.vmem [shape: f32[6], index: 1, kind: input, shape index: {}]   ;;  %s194_s2 = inlined_call_operand.<no memory space> [shape: f32[1], index: 2, kind: input, shape index: {}]   ;;  %s195_s3 = inlined_call_operand.hbm [shape: f32[1,2], index: 3, kind: output, shape index: {}]  }
   0x1   :  { %10 = vsyncpa [#allocation4], 0  ;;  %s19_s14 = sshll.u32 %s193_s1, 4  ;;  %s20_s14 = int_to_ptr.vmem [resolvable:$true] %s19_s14 }
   0x2   :  { %s96_s15 = scalar_lea.vmem %s20_s14, 16  ;;  %p101_p1 = scmp.lt.s32.totalorder %s20_s14, %s20_s14 }
   0x3   :  { %p97_p0 = scmp.ne.s32.totalorder %s20_s14, %s96_s15  ;;  %p102_p2 = scmp.lt.s32.totalorder %s96_s15, %s96_s15 }
   0x5   :  { %p103_p3 = por %p102_p2, %p101_p1 }
   0x7   :  { %p104_p4 = pnand %p103_p3, %p97_p0 }
   0x9   :  { %107 = shalt.err (!%p104_p4)
}
   0xa   :  { %s134_s16 = smov [#allocation3]  }
   0xb   :  { %22 = dma.vmem_to_smem %s20_s14, 16, %s134_s16, [#allocation5]  }
   0xc   :  { %130 = dma.done.wait [#allocation5], 16  }
   0xd   :  { %131 = vsyncadd [#allocation5], 4294967280 }
   0xe   :  { %28 = sfence }
   0xf   :  { %s30_s17 = sld [smem:[#allocation3]]  ;;  %s84_s18 = sld [smem:[#allocation3 + $0x1]]  ;;  %v29_v0 = vld [vmem:[%s192_s0] sm:$0x1]  ;;  %v33_v1 = vld [vmem:[%s192_s0 + $0x1] sm:$0x1]  ;;  %v59_v22 = vstv %s194_s2 }
  0x10   :  { %s85_s19 = sld [smem:[#allocation3 + $0x2]]  ;;  %s86_s20 = sld [smem:[#allocation3 + $0x3]]  ;;  %v38_v2 = vld [vmem:[%s192_s0 + $0x2] sm:$0x1]  ;;  %v43_v7 = vld [vmem:[%s192_s0 + $0x3] sm:$0x1] }
  0x11   :  { %s87_s21 = sld [smem:[#allocation3 + $0x4]]  ;;  %s88_s22 = sld [smem:[#allocation3 + $0x5]]  ;;  %v48_v11 = vld [vmem:[%s192_s0 + $0x4] sm:$0x1]  ;;  %v53_v15 = vld [vmem:[%s192_s0 + $0x5] sm:$0x1] }
  0x12   :  { %s135_s9 = smov [#allocation6]   ;;  %vm67_vm0 = vcmask 8192  }
  0x13   :  { %s75_s10 = sshll.u32 %s135_s9, 4  ;;  %s76_s10 = int_to_ptr.vmem [resolvable:$true] %s75_s10 }
  0x14   :  { %s108_s0 = scalar_lea.vmem %s76_s10, 16  ;;  %s112_s11 = scalar_lea.vmem %s76_s10, 32 }
  0x15   :  { %v31_v3 = vstv %s30_s17  ;;  %v35_v5 = vstv %s84_s18  ;;  %p109_p5 = scmp.ne.s32.totalorder %s76_s10, %s108_s0  ;;  %p113_p6 = scmp.lt.s32.totalorder %s76_s10, %s76_s10 }
  0x16   :  { %v32_v4 = vmul.f32 %v31_v3, %v29_v0  ;;  %v40_v6 = vstv %s85_s19  ;;  %v36_v8 = vmul.f32 %v35_v5, %v33_v1  ;;  %v45_v10 = vstv %s86_s20  ;;  %p114_p7 = scmp.lt.s32.totalorder %s112_s11, %s108_s0 }
  0x17   :  { %v41_v9 = vmul.f32 %v40_v6, %v38_v2  ;;  %v50_v12 = vstv %s87_s21  ;;  %v46_v14 = vmul.f32 %v45_v10, %v43_v7  ;;  %v55_v16 = vstv %s88_s22 }
  0x18   :  { %v37_v13 = vadd.f32 %v36_v8, %v32_v4  ;;  %v51_v18 = vmul.f32 %v50_v12, %v48_v11  ;;  %v56_v20 = vmul.f32 %v55_v16, %v53_v15  ;;  %p115_p8 = por %p114_p7, %p113_p6 }
  0x1a   :  { %v42_v17 = vadd.f32 %v41_v9, %v37_v13  ;;  %p116_p9 = pnand %p115_p8, %p109_p5 }
  0x1c   :  { %v47_v19 = vadd.f32 %v46_v14, %v42_v17 }
  0x1e   :  { %v52_v21 = vadd.f32 %v51_v18, %v47_v19 }
  0x20   :  { %v57_v23 = vadd.f32 %v56_v20, %v52_v21 }
  0x22   :  { %v60_v24 = vadd.f32 %v59_v22, %v57_v23 }
  0x24   :  { %v89_v25 = vmul.f32 -1.442695, %v60_v24 }
  0x26   :  { %92 = vpow2.f32 %v89_v25 }
  0x30   :  { %v93_v26 = vpop.eup %92 }
  0x31   :  { %v64_v27 = vadd.f32 1.0, %v93_v26 }
  0x33   :  { %94 = vrcp.f32 %v64_v27 }
  0x3d   :  { %v95_v28 = vpop.eup %94 }
  0x3e   :  { %68 = vst.msk [vmem:[#allocation6] sm:$0x1] %vm67_vm0, %v95_v28 }
  0x3f   :  { %119 = shalt.err (!%p116_p9)
}
  0x40   :  { %s120_s13 = scalar_lea.hbm %s195_s3, 16 }
  0x41   :  { %p121_p10 = scmp.ne.s32.totalorder %s195_s3, %s120_s13  ;;  %p124_p11 = scmp.lt.u32.totalorder %s120_s13, %s195_s3 }
  0x43   :  { %p126_p12 = pnand %p124_p11, %p121_p10 }
  0x45   :  { %129 = shalt.err (!%p126_p12)
}
  0x46   :  { %78 = dma.vmem_to_hbm [thread:$0]  %s76_s10, 16, %s195_s3, [#allocation4]  }
  0x47   :  { %132 = dma.done.wait [#allocation4], 16  }
  0x48   :  { %133 = vsyncadd [#allocation4], 4294967280 }
  0x49   :  { %82 = vsyncpa [#allocation4], 1 }
  0x4a   :  { %83 = vsyncpa [#allocation5], 1 }

</bundles_post_ra>
